<compile_context>
chip_gen: v7x
topology: tpu7x:2x2x1
jax: 0.10.0
libtpu: 0.0.40
codegen_flags: <defaults>
</compile_context>

<pallas_src>
import functools

import jax
import jax.numpy as jnp
from jax.experimental import pallas as pl
from jax.experimental.pallas import tpu as pltpu

_SMALL_PROBLEM_BYTES = 1 << 20        # below this: one block, no grid split
_TARGET_BLOCK_BYTES = 2 << 20         # ~2 MiB input tile for streaming
_MAX_ROW_TILE = 4096
_MIN_GRID_STEPS = 4                   # >=2 blocks per TensorCore on v7x
_VMEM_LIMIT_BYTES = 40 * 1024 * 1024  # <= ~40 MiB; safe on v7x's 64 MiB VMEM


def _iln_kernel(x_ref, g_ref, b_ref, o_ref, *, inv_c, inv_cm1, eps):
    # x_ref: (rt, C) row tile; g_ref/b_ref: (1, C) f32 affine params.
    x = x_ref[...].astype(jnp.float32)
    # Single-pass moments; the two sums are independent cross-lane reductions.
    s1 = jnp.sum(x, axis=-1, keepdims=True)
    s2 = jnp.sum(x * x, axis=-1, keepdims=True)
    mean = s1 * inv_c
    # Unbiased variance (torch.var default): (sum(x^2) - C*mean^2) / (C-1).
    var = (s2 - s1 * mean) * inv_cm1
    var = jnp.maximum(var, 0.0)                 # guard f32 cancellation
    inv_std = jax.lax.rsqrt(var + eps)
    y = (x - mean) * inv_std
    o_ref[...] = (y * g_ref[...] + b_ref[...]).astype(o_ref.dtype)


def _pick_row_tile(rows, channel, itemsize):
    sub = max(8, 32 // itemsize)                # f32 -> 8, bf16 -> 16
    if rows <= sub or rows * channel * itemsize <= _SMALL_PROBLEM_BYTES:
        return rows                             # single block (full-dim block)
    rt = _TARGET_BLOCK_BYTES // (channel * itemsize)
    rt = min(rt, _MAX_ROW_TILE, pl.cdiv(rows, _MIN_GRID_STEPS))
    rt = max(sub, (rt // sub) * sub)
    return rt


def instant_layer_norm_1d(inpt, gain, bias, *, eps=1e-5):
    """inpt: (seq_len, b_size, channel); gain/bias: (1, 1, channel).

    Uses unbiased variance (divide by C-1), matching torch.var's default.
    channel == 1 yields NaN, exactly as the PyTorch module would.
    """
    seq_len, b_size, channel = inpt.shape
    rows = seq_len * b_size
    itemsize = jnp.dtype(inpt.dtype).itemsize

    rt = _pick_row_tile(rows, channel, itemsize)
    grid_rows = pl.cdiv(rows, rt)

    # Contiguous collapse/expand: no HBM copies.
    x2d = inpt.reshape(rows, channel)
    g2d = gain.reshape(1, channel).astype(jnp.float32)
    b2d = bias.reshape(1, channel).astype(jnp.float32)

    inv_cm1 = 1.0 / (channel - 1) if channel > 1 else float("nan")
    kernel = functools.partial(
        _iln_kernel,
        inv_c=1.0 / channel,
        inv_cm1=inv_cm1,
        eps=float(eps),
    )

    out2d = pl.pallas_call(
        kernel,
        out_shape=jax.ShapeDtypeStruct((rows, channel), inpt.dtype),
        grid_spec=pltpu.PrefetchScalarGridSpec(
            num_scalar_prefetch=0,
            grid=(grid_rows,),
            in_specs=[
                pl.BlockSpec((rt, channel), lambda i: (i, 0)),
                pl.BlockSpec((1, channel), lambda i: (0, 0)),
                pl.BlockSpec((1, channel), lambda i: (0, 0)),
            ],
            out_specs=pl.BlockSpec((rt, channel), lambda i: (i, 0)),
        ),
        compiler_params=pltpu.CompilerParams(
            dimension_semantics=("parallel",),
            vmem_limit_bytes=_VMEM_LIMIT_BYTES,
        ),
    )(x2d, g2d, b2d)

    return out2d.reshape(seq_len, b_size, channel)


def _reference(inpt, gain, bias, eps=1e-5):
    # Pure-JAX reference mirroring the PyTorch forward (unbiased variance).
    mean = jnp.mean(inpt, axis=-1, keepdims=True)
    var = jnp.var(inpt, axis=-1, keepdims=True, ddof=1)
    std = jnp.sqrt(var + eps)
    x = (inpt - mean) / std
    return x * gain + bias


if __name__ == "__main__":
    key = jax.random.PRNGKey(0)
    k1, k2, k3, k4, k5 = jax.random.split(key, 5)

    # Case 1: module-consistent small shapes (seq=8, batch=2, num_features=32).
    seq_len, b_size, channel = 8, 2, 32
    x = jax.random.normal(k1, (seq_len, b_size, channel), jnp.float32)
    gain = 1.0 + 0.1 * jax.random.normal(k2, (1, 1, channel), jnp.float32)
    bias = 0.1 * jax.random.normal(k3, (1, 1, channel), jnp.float32)
    out = jax.block_until_ready(instant_layer_norm_1d(x, gain, bias, eps=1e-5))
    ref = _reference(x, gain, bias, eps=1e-5)
    assert out.shape == (seq_len, b_size, channel)
    assert jnp.allclose(out, ref, atol=2e-5, rtol=2e-5), "mismatch (case 1)"

    # Case 2: row count not a multiple of the sublane count (single full-dim
    # block, no padding anywhere).
    x2 = jax.random.normal(k4, (5, 3, channel), jnp.float32)
    out2 = jax.block_until_ready(instant_layer_norm_1d(x2, gain, bias, eps=1e-5))
    ref2 = _reference(x2, gain, bias, eps=1e-5)
    assert out2.shape == (5, 3, channel)
    assert jnp.allclose(out2, ref2, atol=2e-5, rtol=2e-5), "mismatch (case 2)"

    # Case 3: multi-block path with a partial last row block and a channel
    # count that is not a multiple of 128 (exercises clipped edge writeback
    # and the unpadded-channel block).
    c3 = 200
    x3 = jax.random.normal(k5, (130, 11, c3), jnp.float32)
    g3 = 1.0 + 0.1 * jax.random.normal(k2, (1, 1, c3), jnp.float32)
    b3 = 0.1 * jax.random.normal(k3, (1, 1, c3), jnp.float32)
    out3 = jax.block_until_ready(instant_layer_norm_1d(x3, g3, b3, eps=1e-5))
    ref3 = _reference(x3, g3, b3, eps=1e-5)
    assert out3.shape == (130, 11, c3)
    assert jnp.allclose(out3, ref3, atol=2e-5, rtol=2e-5), "mismatch (case 3)"

    print("KERNEL_OK")
</pallas_src>

<mosaic_0001>
module attributes {stable_mosaic.version = 11 : i64} {
  func.func @_iln_kernel(%arg0: i32, %arg1: memref<16x32xf32, #tpu.memory_space<vmem>>, %arg2: memref<1x32xf32, #tpu.memory_space<vmem>>, %arg3: memref<1x32xf32, #tpu.memory_space<vmem>>, %arg4: memref<16x32xf32, #tpu.memory_space<vmem>>) attributes {dimension_semantics = [#tpu.dimension_semantics<parallel>], iteration_bounds = array<i64: 1>, scalar_prefetch = 0 : i64, scratch_operands = 0 : i64, tpu.core_type = #tpu.core_type<tc>, window_params = [{transform_indices = @transform_0, window_bounds = array<i64: 16, 32>}, {pipeline_mode = #tpu.pipeline_mode<synchronous>, transform_indices = @transform_1, window_bounds = array<i64: 1, 32>}, {pipeline_mode = #tpu.pipeline_mode<synchronous>, transform_indices = @transform_2, window_bounds = array<i64: 1, 32>}, {transform_indices = @transform_3, window_bounds = array<i64: 16, 32>}]} {
    %c0 = arith.constant 0 : index
    %c0_0 = arith.constant 0 : index
    %0 = vector.load %arg1[%c0, %c0_0] : memref<16x32xf32, #tpu.memory_space<vmem>>, vector<16x32xf32>
    %cst = arith.constant dense<0.000000e+00> : vector<16xf32>
    %1 = vector.multi_reduction <add>, %0, %cst [1] : vector<16x32xf32> to vector<16xf32>
    %2 = vector.shape_cast %1 : vector<16xf32> to vector<16x1xf32>
    %3 = arith.mulf %0, %0 : vector<16x32xf32>
    %cst_1 = arith.constant dense<0.000000e+00> : vector<16xf32>
    %4 = vector.multi_reduction <add>, %3, %cst_1 [1] : vector<16x32xf32> to vector<16xf32>
    %5 = vector.shape_cast %4 : vector<16xf32> to vector<16x1xf32>
    %cst_2 = arith.constant 3.125000e-02 : f32
    %6 = vector.broadcast %cst_2 : f32 to vector<16x1xf32>
    %7 = arith.mulf %2, %6 : vector<16x1xf32>
    %8 = arith.mulf %2, %7 : vector<16x1xf32>
    %9 = arith.subf %5, %8 : vector<16x1xf32>
    %cst_3 = arith.constant 0.0322580636 : f32
    %10 = vector.broadcast %cst_3 : f32 to vector<16x1xf32>
    %11 = arith.mulf %9, %10 : vector<16x1xf32>
    %cst_4 = arith.constant 0.000000e+00 : f32
    %12 = vector.broadcast %cst_4 : f32 to vector<16x1xf32>
    %13 = arith.maximumf %11, %12 : vector<16x1xf32>
    %cst_5 = arith.constant 9.99999974E-6 : f32
    %14 = vector.broadcast %cst_5 : f32 to vector<16x1xf32>
    %15 = arith.addf %13, %14 : vector<16x1xf32>
    %16 = math.rsqrt %15 : vector<16x1xf32>
    %17 = vector.broadcast %7 : vector<16x1xf32> to vector<16x32xf32>
    %18 = arith.subf %0, %17 : vector<16x32xf32>
    %19 = vector.broadcast %16 : vector<16x1xf32> to vector<16x32xf32>
    %20 = arith.mulf %18, %19 : vector<16x32xf32>
    %c0_6 = arith.constant 0 : index
    %c0_7 = arith.constant 0 : index
    %21 = vector.load %arg2[%c0_6, %c0_7] : memref<1x32xf32, #tpu.memory_space<vmem>>, vector<1x32xf32>
    %22 = vector.broadcast %21 : vector<1x32xf32> to vector<16x32xf32>
    %23 = arith.mulf %20, %22 : vector<16x32xf32>
    %c0_8 = arith.constant 0 : index
    %c0_9 = arith.constant 0 : index
    %24 = vector.load %arg3[%c0_8, %c0_9] : memref<1x32xf32, #tpu.memory_space<vmem>>, vector<1x32xf32>
    %25 = vector.broadcast %24 : vector<1x32xf32> to vector<16x32xf32>
    %26 = arith.addf %23, %25 : vector<16x32xf32>
    %c0_10 = arith.constant 0 : index
    %c0_11 = arith.constant 0 : index
    %27 = vector.load %arg4[%c0_10, %c0_11] : memref<16x32xf32, #tpu.memory_space<vmem>>, vector<16x32xf32>
    tpu.vector_store %arg4[%c0_10, %c0_11], %26 {strides = array<i32>} : memref<16x32xf32, #tpu.memory_space<vmem>>, vector<16x32xf32>,
    return
  }
  func.func @transform_0(%arg0: i32) -> (i32, i32) {
    %c0_i32 = arith.constant 0 : i32
    %c0_i32_0 = arith.constant 0 : i32
    return %arg0, %c0_i32 : i32, i32
  }
  func.func @transform_1(%arg0: i32) -> (i32, i32) {
    %c0_i32 = arith.constant 0 : i32
    %c0_i32_0 = arith.constant 0 : i32
    %c0_i32_1 = arith.constant 0 : i32
    return %c0_i32, %c0_i32_0 : i32, i32
  }
  func.func @transform_2(%arg0: i32) -> (i32, i32) {
    %c0_i32 = arith.constant 0 : i32
    %c0_i32_0 = arith.constant 0 : i32
    %c0_i32_1 = arith.constant 0 : i32
    return %c0_i32, %c0_i32_0 : i32, i32
  }
  func.func @transform_3(%arg0: i32) -> (i32, i32) {
    %c0_i32 = arith.constant 0 : i32
    %c0_i32_0 = arith.constant 0 : i32
    return %arg0, %c0_i32 : i32, i32
  }
}

</mosaic_0001>

<bundles_post_ra>
// kernel: tpu_custom_call.1
= control target key start
LH: loop header
LB: loop body
LE: loop exit
PB: predicated region body
PF: predicated region fallthrough
CT: control target
= control target key end

     0   :  { %8 = vsyncpa [#allocation3], 0  ;;  %s225_s0 = inlined_call_operand.hbm [shape: f32[16,32], index: 0, kind: input, shape index: {}]   ;;  %s226_s1 = inlined_call_operand.vmem [shape: f32[1,32], index: 1, kind: input, shape index: {}]   ;;  %s227_s2 = inlined_call_operand.vmem [shape: f32[1,32], index: 2, kind: input, shape index: {}]   ;;  %s228_s3 = inlined_call_operand.hbm [shape: f32[16,32], index: 3, kind: output, shape index: {}]  }
   0x1   :  { %9 = vsyncpa [#allocation4], 0  ;;  %s159_s12 = smov [#allocation2]   ;;  %s111_s16 = scalar_lea.hbm %s225_s0, 256 }
   0x2   :  { %s15_s13 = sshll.u32 %s159_s12, 4  ;;  %p112_p0 = scmp.ne.s32.totalorder %s225_s0, %s111_s16  ;;  %s16_s13 = int_to_ptr.vmem [resolvable:$true] %s15_s13 }
   0x3   :  { %p115_p1 = scmp.lt.u32.totalorder %s111_s16, %s225_s0 }
   0x5   :  { %p117_p2 = pnand %p115_p1, %p112_p0 }
   0x7   :  { %120 = shalt.err (!%p117_p2)
}
   0x8   :  { %s121_s21 = scalar_lea.vmem %s16_s13, 256  ;;  %p126_p4 = scmp.lt.s32.totalorder %s16_s13, %s16_s13 }
   0x9   :  { %p122_p3 = scmp.ne.s32.totalorder %s16_s13, %s121_s21  ;;  %p127_p5 = scmp.lt.s32.totalorder %s121_s21, %s121_s21 }
   0xb   :  { %p128_p6 = por %p127_p5, %p126_p4 }
   0xd   :  { %p129_p7 = pnand %p128_p6, %p122_p3 }
   0xf   :  { %132 = shalt.err (!%p129_p7)
}
  0x10   :  { %s160_s22 = smov 128   ;;  %s161_s23 = smov 8  }
  0x11   :  { %21 = dma.hbm_to_vmem [thread:$0]  %s225_s0, 256, %s16_s13, [#allocation3], %s160_s22, %s160_s22, %s161_s23  }
  0x12   :  { %155 = dma.done.wait [#allocation3], 256  }
  0x13   :  { %156 = vsyncadd [#allocation3], 4294967040  ;;  %vm31_vm0 = vcmask 261120   ;;  %v29_v0 = vld [vmem:[#allocation2] sm:$0xff]  ;;  %v30_v1 = vld [vmem:[#allocation2 + $0x8] sm:$0xff]  ;;  %s162_s29 = smov [#allocation5]  }
  0x14   :  { %v32_v2 = vsel %vm31_vm0, %v29_v0, 0.0  ;;  %v38_v3 = vmul.f32 %v29_v0, %v29_v0  ;;  %v39_v4 = vmul.f32 %v30_v1, %v30_v1  ;;  %v35_v6 = vsel %vm31_vm0, %v30_v1, 0.0  ;;  %v101_v26 = vld [vmem:[%s226_s1] ss:$0 sm:$0xff]  ;;  %s89_s30 = sshll.u32 %s162_s29, 4  ;;  %s90_s30 = int_to_ptr.vmem [resolvable:$true] %s89_s30 }
  0x15   :  { %33 = vadd.xlane.f32.xlu0 %v32_v2  ;;  %v102_v28 = vld [vmem:[%s227_s2] ss:$0 sm:$0xff]  ;;  %s133_s1 = scalar_lea.vmem %s90_s30, 256  ;;  %p138_p9 = scmp.lt.s32.totalorder %s90_s30, %s90_s30 }
  0x16   :  { %v40_v5 = vsel %vm31_vm0, %v38_v3, 0.0  ;;  %v43_v7 = vsel %vm31_vm0, %v39_v4, 0.0  ;;  %p134_p8 = scmp.ne.s32.totalorder %s90_s30, %s133_s1  ;;  %p139_p10 = scmp.lt.s32.totalorder %s133_s1, %s133_s1 }
  0x17   :  { %41 = vadd.xlane.f32.xlu1 %v40_v5 }
  0x18   :  { %p140_p11 = por %p139_p10, %p138_p9 }
  0x19   :  { %36 = vadd.xlane.f32.xlu0 %v35_v6 }
  0x1a   :  { %p141_p12 = pnand %p140_p11, %p134_p8 }
  0x1b   :  { %44 = vadd.xlane.f32.xlu1 %v43_v7 }
  0xa2   :  { %v34_v8 = vpop.xlane.xlu0 %33 }
  0xa3   :  { %v46_v9 = vmul.f32 0.03125, %v34_v8 }
  0xa4   :  { %v42_v10 = vpop.xlane.xlu1 %41 }
  0xa5   :  { %v48_v11 = vmul.f32 %v46_v9, %v34_v8  ;;  %v60_v24 = vsub.f32 %v29_v0, %v46_v9 }
  0xa6   :  { %v37_v12 = vpop.xlane.xlu0 %36 }
  0xa7   :  { %v50_v13 = vsub.f32 %v42_v10, %v48_v11  ;;  %v47_v14 = vmul.f32 0.03125, %v37_v12 }
  0xa8   :  { %v45_v15 = vpop.xlane.xlu1 %44 }
  0xa9   :  { %v52_v16 = vmul.f32 0.032258064, %v50_v13  ;;  %v49_v17 = vmul.f32 %v47_v14, %v37_v12  ;;  %v61_v29 = vsub.f32 %v30_v1, %v47_v14 }
  0xab   :  { %v54_v18 = vmax.f32 %v52_v16, 0.0  ;;  %v51_v19 = vsub.f32 %v45_v15, %v49_v17 }
  0xad   :  { %v56_v20 = vadd.f32 1e-05, %v54_v18  ;;  %v53_v21 = vmul.f32 0.032258064, %v51_v19 }
  0xaf   :  { %107 = vrsqrt.f32 %v56_v20  ;;  %v55_v22 = vmax.f32 %v53_v21, 0.0 }
  0xb1   :  { %v57_v23 = vadd.f32 1e-05, %v55_v22 }
  0xb3   :  { %109 = vrsqrt.f32 %v57_v23 }
  0xb9   :  { %v108_v25 = vpop.eup %107 }
  0xba   :  { %v62_v27 = vmul.f32 %v108_v25, %v60_v24 }
  0xbc   :  { %v71_v30 = vmul.f32 %v101_v26, %v62_v27 }
  0xbd   :  { %v110_v31 = vpop.eup %109 }
  0xbe   :  { %v63_v32 = vmul.f32 %v110_v31, %v61_v29  ;;  %v80_v33 = vadd.f32 %v102_v28, %v71_v30 }
  0xc0   :  { %v72_v34 = vmul.f32 %v101_v26, %v63_v32  ;;  %82 = vst.msk [vmem:[#allocation5] sm:$0xff] %vm31_vm0, %v80_v33 }
  0xc2   :  { %v81_v35 = vadd.f32 %v102_v28, %v72_v34 }
  0xc4   :  { %83 = vst.msk [vmem:[#allocation5 + $0x8] sm:$0xff] %vm31_vm0, %v81_v35 }
  0xc5   :  { %144 = shalt.err (!%p141_p12)
}
  0xc6   :  { %s145_s5 = scalar_lea.hbm %s228_s3, 256 }
  0xc7   :  { %p146_p13 = scmp.ne.s32.totalorder %s228_s3, %s145_s5  ;;  %p149_p0 = scmp.lt.u32.totalorder %s145_s5, %s228_s3 }
  0xc9   :  { %p151_p1 = pnand %p149_p0, %p146_p13 }
  0xcb   :  { %154 = shalt.err (!%p151_p1)
}
  0xcc   :  { %95 = dma.vmem_to_hbm [thread:$0]  %s90_s30, 256, %s228_s3, [#allocation4], %s160_s22, %s160_s22, %s161_s23  }
  0xcd   :  { %157 = dma.done.wait [#allocation4], 256  }
  0xce   :  { %158 = vsyncadd [#allocation4], 4294967040 }
  0xcf   :  { %99 = vsyncpa [#allocation3], 1 }
  0xd0   :  { %100 = vsyncpa [#allocation4], 1 }

</bundles_post_ra>
